<compile_context>
chip_gen: v7x
topology: tpu7x:2x2x1
jax: 0.10.0
libtpu: 0.0.40
codegen_flags: <defaults>
</compile_context>

<pallas_src>
import math

import jax
import jax.numpy as jnp
from jax import lax
from jax.experimental import pallas as pl
from jax.experimental.pallas import tpu as pltpu


def _make_arc_margin_kernel(C, s, cos_m, sin_m, th, mm, easy_margin, mask_tail,
                            eps):
    """Returns a kernel closure with the ArcFace constants baked in."""

    def kernel(x_ref, w_ref, lab_ref, out_ref):
        cj = pl.program_id(0)  # class-tile index (outer grid axis)

        x = x_ref[...].astype(jnp.float32)      # [tile_b, D]
        w = w_ref[...].astype(jnp.float32)      # [tile_c, D]

        # F.normalize semantics: v / max(||v||, eps).  Row norms are computed
        # in-kernel (cheap VPU/XLU work, fully hidden under the weight DMA),
        # which removes the wrapper-side second pass over the weight matrix.
        xn = x * (1.0 / jnp.maximum(
            jnp.sqrt(jnp.sum(x * x, axis=1, keepdims=True)), eps))
        wn = w * (1.0 / jnp.maximum(
            jnp.sqrt(jnp.sum(w * w, axis=1, keepdims=True)), eps))

        # cosine = xn @ wn^T : transpose-free contraction over the shared
        # feature axis, MXU with f32 accumulation.
        cosine = lax.dot_general(
            xn, wn,
            dimension_numbers=(((1,), (1,)), ((), ())),
            preferred_element_type=jnp.float32)             # [tile_b, tile_c]

        tb, tc = cosine.shape
        class_ids = cj * tc + lax.broadcasted_iota(jnp.int32, (tb, tc), 1)

        if mask_tail:
            # Ragged last class tile: zero the padded columns so garbage rows
            # of the edge weight block can never feed sqrt/where.  (These
            # columns are also dropped by the masked edge store.)
            cosine = jnp.where(class_ids < C, cosine, 0.0)

        # phi = cos(theta + m); clamp 1 - cos^2 against fp rounding.
        sine = jnp.sqrt(jnp.maximum(1.0 - cosine * cosine, 0.0))
        phi = cosine * cos_m - sine * sin_m
        if easy_margin:
            phi = jnp.where(cosine > 0.0, phi, cosine)
        else:
            phi = jnp.where(cosine > th, phi, cosine - mm)

        # One-hot blend; iota is offset by the tile's global class base.
        is_target = class_ids == lab_ref[...]               # [tile_b,1] bcast
        out_ref[...] = (jnp.where(is_target, phi, cosine) * s).astype(
            out_ref.dtype)

    return kernel


def arc_margin_product(x, weight, label, *, s=30.0, m=0.5, easy_margin=False,
                       tile_c=None, tile_b=None, stream_dtype=None,
                       out_dtype=jnp.float32):
    """ArcFace margin product.

    x:      [B, in_features]
    weight: [out_features, in_features]
    label:  [B] int
    returns [B, out_features] (out_dtype, default float32)
    """
    B, D = x.shape
    C, D2 = weight.shape
    assert D == D2, (D, D2)
    eps = 1e-12  # F.normalize default

    # Optional reduced-precision streaming (halves the dominant HBM stream).
    x_in = x if stream_dtype is None else x.astype(stream_dtype)
    w_in = weight if stream_dtype is None else weight.astype(stream_dtype)
    lab2d = label.reshape(B, 1).astype(jnp.int32)

    w_item = w_in.dtype.itemsize
    x_item = x_in.dtype.itemsize

    # ---- batch tiling (second "parallel" axis; bounds VMEM for large B) ----
    if tile_b is None:
        tile_b = B if B <= 512 else 256
    tile_b = int(tile_b)
    if tile_b >= B:
        tile_b = B                       # full-dim block (always legal)
    else:
        tile_b = max(8, (tile_b // 8) * 8)   # sublane-aligned partial blocks
    num_b = pl.cdiv(B, tile_b)

    # ---- VMEM capacity (v5e/v6e: 128 MiB, v7x: 64 MiB) --------------------
    try:
        vmem_cap = int(pltpu.get_tpu_info().vmem_capacity_bytes)
    except Exception:
        vmem_cap = 64 * 1024 * 1024      # conservative (v7x) fallback

    # ---- class tiling: lane-dense, bandwidth- and VMEM-budget-aware -------
    if C <= 128:
        tile_c = C                       # single full-dim block, no padding
    else:
        if tile_c is None:
            # ~8 MiB weight tile per step amortizes the ~0.35us/step overhead
            # even at v7x HBM bandwidth.
            cand_bw = (8 * 1024 * 1024) // (D * w_item)
            # VMEM budget: double-buffered weight/output/x tiles + f32 temps.
            budget = int(0.45 * vmem_cap)
            per_c = 2 * D * w_item + 2 * tile_b * 4 + D * 4 + 5 * tile_b * 4
            fixed = 2 * tile_b * D * x_item + 2 * tile_b * 4 + (1 << 20)
            cand_budget = max(128, (budget - fixed) // per_c)
            cand = min(cand_bw, cand_budget, 8192)
            # Keep >= 2 class tiles so both v7x TensorCores get work.
            cand = min(cand, ((pl.cdiv(C, 128) + 1) // 2) * 128)
        else:
            cand = int(tile_c)
        # Multiple of 128, and never larger than C (no padded weight copy).
        tile_c = max(128, min((cand // 128) * 128, (C // 128) * 128))
    num_c = pl.cdiv(C, tile_c)
    mask_tail = (C % tile_c) != 0

    # ---- VMEM limit derived from the actual footprint ---------------------
    stream_bytes = (2 * tile_c * D * w_item       # weight (double-buffered)
                    + 2 * tile_b * tile_c * 4     # output tiles
                    + 2 * tile_b * D * x_item     # x tiles
                    + 2 * tile_b * 4)             # labels
    temp_bytes = (tile_c * D * 4                  # normalized weight tile
                  + tile_b * D * 4                # normalized x tile
                  + 5 * tile_b * tile_c * 4)      # cosine/sine/phi/iota temps
    vmem_limit = int(min(0.9 * vmem_cap,
                         max(32 * 1024 * 1024,
                             int(1.3 * (stream_bytes + temp_bytes)) + (2 << 20))))

    kernel = _make_arc_margin_kernel(
        int(C), float(s), math.cos(m), math.sin(m),
        math.cos(math.pi - m), math.sin(math.pi - m) * m,
        bool(easy_margin), bool(mask_tail), eps)

    cost = pl.CostEstimate(
        flops=int(2 * B * C * D + 4 * C * D + 4 * B * D),
        transcendentals=int(B * C + B + C),
        bytes_accessed=int(num_c * B * D * x_item + C * D * w_item
                           + B * C * jnp.dtype(out_dtype).itemsize + B * 4),
    )

    out = pl.pallas_call(
        kernel,
        out_shape=jax.ShapeDtypeStruct((B, C), out_dtype),
        grid=(num_c, num_b),   # class tiles outer (weight read exactly once)
        in_specs=[
            pl.BlockSpec((tile_b, D), lambda cj, bi: (bi, 0)),      # x
            pl.BlockSpec((tile_c, D), lambda cj, bi: (cj, 0)),      # weight
            pl.BlockSpec((tile_b, 1), lambda cj, bi: (bi, 0)),      # labels
        ],
        out_specs=pl.BlockSpec((tile_b, tile_c), lambda cj, bi: (bi, cj)),
        compiler_params=pltpu.CompilerParams(
            dimension_semantics=("parallel", "parallel"),
            vmem_limit_bytes=vmem_limit,
        ),
        cost_estimate=cost,
    )(x_in, w_in, lab2d)

    return out


def _reference(x, weight, label, *, s=30.0, m=0.5, easy_margin=False):
    eps = 1e-12
    xn = x / jnp.maximum(jnp.linalg.norm(x, axis=1, keepdims=True), eps)
    wn = weight / jnp.maximum(jnp.linalg.norm(weight, axis=1, keepdims=True), eps)
    cosine = xn @ wn.T
    sine = jnp.sqrt(jnp.maximum(1.0 - cosine ** 2, 0.0))
    phi = cosine * math.cos(m) - sine * math.sin(m)
    if easy_margin:
        phi = jnp.where(cosine > 0, phi, cosine)
    else:
        phi = jnp.where(cosine > math.cos(math.pi - m),
                        phi, cosine - math.sin(math.pi - m) * m)
    one_hot = jax.nn.one_hot(label, cosine.shape[1], dtype=cosine.dtype)
    return (one_hot * phi + (1.0 - one_hot) * cosine) * s


if __name__ == "__main__":
    key = jax.random.PRNGKey(0)

    # Case 1: tiny shapes implied by the module (single full-dim class block).
    # Case 2: C > 128 -> streamed class grid with a ragged last class tile.
    # Case 3: forced batch tiling with a ragged last batch tile + ragged C.
    cases = [
        dict(B=8, D=32, C=16, easy_margin=True, tile_c=None, tile_b=None),
        dict(B=8, D=64, C=300, easy_margin=False, tile_c=None, tile_b=None),
        dict(B=12, D=32, C=200, easy_margin=False, tile_c=None, tile_b=8),
    ]

    for i, cfg in enumerate(cases):
        key, kx, kw, kl = jax.random.split(key, 4)
        B, D, C = cfg["B"], cfg["D"], cfg["C"]

        x = jax.random.normal(kx, (B, D), dtype=jnp.float32)
        # nn.init.xavier_uniform_ on weight [out_features, in_features]
        bound = math.sqrt(6.0 / (D + C))
        weight = jax.random.uniform(kw, (C, D), dtype=jnp.float32,
                                    minval=-bound, maxval=bound)
        label = jax.random.randint(kl, (B,), 0, C, dtype=jnp.int32)

        out = arc_margin_product(x, weight, label, s=30.0, m=0.5,
                                 easy_margin=cfg["easy_margin"],
                                 tile_c=cfg["tile_c"], tile_b=cfg["tile_b"])
        out = jax.block_until_ready(out)

        ref = _reference(x, weight, label, s=30.0, m=0.5,
                         easy_margin=cfg["easy_margin"])
        assert out.shape == (B, C)
        err = jnp.max(jnp.abs(out - ref))
        assert jnp.allclose(out, ref, atol=2e-4, rtol=2e-4), (
            f"case {i}: max abs err {err}")

    print("KERNEL_OK")
</pallas_src>

<mosaic_0001>
module attributes {stable_mosaic.version = 11 : i64} {
  func.func @kernel(%arg0: i32, %arg1: i32, %arg2: memref<8x32xf32, #tpu.memory_space<vmem>>, %arg3: memref<16x32xf32, #tpu.memory_space<vmem>>, %arg4: memref<8x1xi32, #tpu.memory_space<vmem>>, %arg5: memref<8x16xf32, #tpu.memory_space<vmem>>) attributes {dimension_semantics = [#tpu.dimension_semantics<parallel>, #tpu.dimension_semantics<parallel>], iteration_bounds = array<i64: 1, 1>, scalar_prefetch = 0 : i64, scratch_operands = 0 : i64, tpu.core_type = #tpu.core_type<tc>, window_params = [{transform_indices = @transform_0, window_bounds = array<i64: 8, 32>}, {transform_indices = @transform_1, window_bounds = array<i64: 16, 32>}, {transform_indices = @transform_2, window_bounds = array<i64: 8, 1>}, {transform_indices = @transform_3, window_bounds = array<i64: 8, 16>}]} {
    %c0 = arith.constant 0 : index
    %c0_0 = arith.constant 0 : index
    %0 = vector.load %arg2[%c0, %c0_0] : memref<8x32xf32, #tpu.memory_space<vmem>>, vector<8x32xf32>
    %c0_1 = arith.constant 0 : index
    %c0_2 = arith.constant 0 : index
    %1 = vector.load %arg3[%c0_1, %c0_2] : memref<16x32xf32, #tpu.memory_space<vmem>>, vector<16x32xf32>
    %2 = arith.mulf %0, %0 : vector<8x32xf32>
    %cst = arith.constant dense<0.000000e+00> : vector<8xf32>
    %3 = vector.multi_reduction <add>, %2, %cst [1] : vector<8x32xf32> to vector<8xf32>
    %4 = vector.shape_cast %3 : vector<8xf32> to vector<8x1xf32>
    %5 = math.sqrt %4 : vector<8x1xf32>
    %cst_3 = arith.constant 9.99999996E-13 : f32
    %6 = vector.broadcast %cst_3 : f32 to vector<8x1xf32>
    %7 = arith.maximumf %5, %6 : vector<8x1xf32>
    %cst_4 = arith.constant 1.000000e+00 : f32
    %8 = vector.broadcast %cst_4 : f32 to vector<8x1xf32>
    %9 = arith.divf %8, %7 : vector<8x1xf32>
    %10 = vector.broadcast %9 : vector<8x1xf32> to vector<8x32xf32>
    %11 = arith.mulf %0, %10 : vector<8x32xf32>
    %12 = arith.mulf %1, %1 : vector<16x32xf32>
    %cst_5 = arith.constant dense<0.000000e+00> : vector<16xf32>
    %13 = vector.multi_reduction <add>, %12, %cst_5 [1] : vector<16x32xf32> to vector<16xf32>
    %14 = vector.shape_cast %13 : vector<16xf32> to vector<16x1xf32>
    %15 = math.sqrt %14 : vector<16x1xf32>
    %cst_6 = arith.constant 9.99999996E-13 : f32
    %16 = vector.broadcast %cst_6 : f32 to vector<16x1xf32>
    %17 = arith.maximumf %15, %16 : vector<16x1xf32>
    %cst_7 = arith.constant 1.000000e+00 : f32
    %18 = vector.broadcast %cst_7 : f32 to vector<16x1xf32>
    %19 = arith.divf %18, %17 : vector<16x1xf32>
    %20 = vector.broadcast %19 : vector<16x1xf32> to vector<16x32xf32>
    %21 = arith.mulf %1, %20 : vector<16x32xf32>
    %cst_8 = arith.constant dense<0.000000e+00> : vector<8x16xf32>
    %22 = tpu.matmul %11, %21, %cst_8 {dimension_numbers = #tpu.dot_dimension_numbers<[1], [1], [0], [0], [0, 0, 1, 0], [], []>} : vector<8x32xf32>, vector<16x32xf32>, vector<8x16xf32> -> vector<8x16xf32>
    %c16_i32 = arith.constant 16 : i32
    %23 = arith.muli %arg0, %c16_i32 : i32
    %24 = tpu.iota {dimensions = array<i32: 1>} : vector<8x16xi32>
    %25 = vector.broadcast %23 : i32 to vector<8x16xi32>
    %26 = arith.addi %25, %24 : vector<8x16xi32>
    %27 = arith.mulf %22, %22 : vector<8x16xf32>
    %cst_9 = arith.constant 1.000000e+00 : f32
    %28 = vector.broadcast %cst_9 : f32 to vector<8x16xf32>
    %29 = arith.subf %28, %27 : vector<8x16xf32>
    %cst_10 = arith.constant 0.000000e+00 : f32
    %30 = vector.broadcast %cst_10 : f32 to vector<8x16xf32>
    %31 = arith.maximumf %29, %30 : vector<8x16xf32>
    %32 = math.sqrt %31 : vector<8x16xf32>
    %cst_11 = arith.constant 0.87758255 : f32
    %33 = vector.broadcast %cst_11 : f32 to vector<8x16xf32>
    %34 = arith.mulf %22, %33 : vector<8x16xf32>
    %cst_12 = arith.constant 0.47942555 : f32
    %35 = vector.broadcast %cst_12 : f32 to vector<8x16xf32>
    %36 = arith.mulf %32, %35 : vector<8x16xf32>
    %37 = arith.subf %34, %36 : vector<8x16xf32>
    %cst_13 = arith.constant 0.000000e+00 : f32
    %38 = vector.broadcast %cst_13 : f32 to vector<8x16xf32>
    %39 = arith.cmpf ogt, %22, %38 : vector<8x16xf32>
    %40 = arith.select %39, %37, %22 : vector<8x16xi1>, vector<8x16xf32>
    %c0_14 = arith.constant 0 : index
    %c0_15 = arith.constant 0 : index
    %41 = vector.load %arg4[%c0_14, %c0_15] : memref<8x1xi32, #tpu.memory_space<vmem>>, vector<8x1xi32>
    %42 = vector.broadcast %41 : vector<8x1xi32> to vector<8x16xi32>
    %43 = arith.cmpi eq, %26, %42 : vector<8x16xi32>
    %44 = arith.select %43, %40, %22 : vector<8x16xi1>, vector<8x16xf32>
    %cst_16 = arith.constant 3.000000e+01 : f32
    %45 = vector.broadcast %cst_16 : f32 to vector<8x16xf32>
    %46 = arith.mulf %44, %45 : vector<8x16xf32>
    %c0_17 = arith.constant 0 : index
    %c0_18 = arith.constant 0 : index
    %47 = vector.load %arg5[%c0_17, %c0_18] : memref<8x16xf32, #tpu.memory_space<vmem>>, vector<8x16xf32>
    tpu.vector_store %arg5[%c0_17, %c0_18], %46 {strides = array<i32>} : memref<8x16xf32, #tpu.memory_space<vmem>>, vector<8x16xf32>,
    return
  }
  func.func @transform_0(%arg0: i32, %arg1: i32) -> (i32, i32) {
    %c0_i32 = arith.constant 0 : i32
    %c0_i32_0 = arith.constant 0 : i32
    return %arg1, %c0_i32 : i32, i32
  }
  func.func @transform_1(%arg0: i32, %arg1: i32) -> (i32, i32) {
    %c0_i32 = arith.constant 0 : i32
    %c0_i32_0 = arith.constant 0 : i32
    return %arg0, %c0_i32 : i32, i32
  }
  func.func @transform_2(%arg0: i32, %arg1: i32) -> (i32, i32) {
    %c0_i32 = arith.constant 0 : i32
    %c0_i32_0 = arith.constant 0 : i32
    return %arg1, %c0_i32 : i32, i32
  }
  func.func @transform_3(%arg0: i32, %arg1: i32) -> (i32, i32) {
    %c0_i32 = arith.constant 0 : i32
    return %arg1, %arg0 : i32, i32
  }
}

</mosaic_0001>

<bundles_post_ra>
// kernel: tpu_custom_call.1
= control target key start
LH: loop header
LB: loop body
LE: loop exit
PB: predicated region body
PF: predicated region fallthrough
CT: control target
= control target key end

     0   :  { %8 = vsyncpa [#allocation3], 0  ;;  %s354_s0 = inlined_call_operand.vmem [shape: f32[8,32], index: 0, kind: input, shape index: {}]   ;;  %s355_s1 = inlined_call_operand.hbm [shape: f32[16,32], index: 1, kind: input, shape index: {}]   ;;  %s356_s2 = inlined_call_operand.vmem [shape: s32[8,1], index: 2, kind: input, shape index: {}]   ;;  %s357_s3 = inlined_call_operand.hbm [shape: f32[8,16], index: 3, kind: output, shape index: {}]  }
   0x1   :  { %9 = vsyncpa [#allocation4], 0  ;;  %s290_s12 = smov [#allocation2]   ;;  %s242_s16 = scalar_lea.hbm %s355_s1, 256 }
   0x2   :  { %s17_s13 = sshll.u32 %s290_s12, 4  ;;  %p243_p0 = scmp.ne.s32.totalorder %s355_s1, %s242_s16  ;;  %s18_s13 = int_to_ptr.vmem [resolvable:$true] %s17_s13 }
   0x3   :  { %p246_p1 = scmp.lt.u32.totalorder %s242_s16, %s355_s1 }
   0x5   :  { %p248_p2 = pnand %p246_p1, %p243_p0 }
   0x7   :  { %251 = shalt.err (!%p248_p2)
}
   0x8   :  { %s252_s21 = scalar_lea.vmem %s18_s13, 256  ;;  %p257_p4 = scmp.lt.s32.totalorder %s18_s13, %s18_s13 }
   0x9   :  { %p253_p3 = scmp.ne.s32.totalorder %s18_s13, %s252_s21  ;;  %p258_p5 = scmp.lt.s32.totalorder %s252_s21, %s252_s21 }
   0xb   :  { %p259_p6 = por %p258_p5, %p257_p4 }
   0xd   :  { %p260_p7 = pnand %p259_p6, %p253_p3 }
   0xf   :  { %263 = shalt.err (!%p260_p7)
}
  0x10   :  { %s291_s22 = smov 128   ;;  %s292_s23 = smov 8  }
  0x11   :  { %23 = dma.hbm_to_vmem [thread:$0]  %s355_s1, 256, %s18_s13, [#allocation3], %s291_s22, %s291_s22, %s292_s23  }
  0x12   :  { %286 = dma.done.wait [#allocation3], 256  }
  0x13   :  { %287 = vsyncadd [#allocation3], 4294967040  ;;  %v30_v0 = vld [vmem:[#allocation2] sm:$0xff]  ;;  %vm33_vm0 = vcmask 261120   ;;  %v31_v2 = vld [vmem:[#allocation2 + $0x8] sm:$0xff]  ;;  %v293_v9 = vmov 0.0|0.0   ;;  %v158_v46 = vlaneseq }
  0x14   :  { %v29_v1 = vld [vmem:[%s354_s0] sm:$0xff]  ;;  %v48_v3 = vmul.f32 %v30_v0, %v30_v0  ;;  %v49_v5 = vmul.f32 %v31_v2, %v31_v2  ;;  %214 = vmatprep.subr.bf16.mxu0 %v293_v9  ;;  %vm294_vm1 = vmmov 0   ;;  %v295_v10 = vmov 0.0   ;;  %vm216_vm8 = vmpackc.low %vm33_vm0, %vm33_vm0 }
  0x15   :  { %v32_v4 = vmul.f32 %v29_v1, %v29_v1  ;;  %211 = vmatprep.mubr.msk.f32.mxu0 %vm294_vm1, %v295_v10  ;;  %v177_v11 = vld [vmem:[%s356_s2] sm:$0xff]  ;;  %v296_v12 = vmov 0   ;;  %v159_v50 = vand.u32 127, %v158_v46  ;;  %s297_s2 = smov [#allocation5]   ;;  %vm184_vm13 = vcmask 130048  }
  0x16   :  { %v50_v6 = vsel %vm33_vm0, %v48_v3, 0.0  ;;  %v53_v8 = vsel %vm33_vm0, %v49_v5, 0.0  ;;  %226 = vset.pattern.permute.xlu1 %v296_v12  ;;  %227 = vset.pattern.permute.xlu0 %v296_v12  ;;  %s192_s28 = sshll.u32 %s297_s2, 4  ;;  %s193_s28 = int_to_ptr.vmem [resolvable:$true] %s192_s28 }
  0x17   :  { %v34_v7 = vsel %vm33_vm0, %v32_v4, 0.0  ;;  %51 = vadd.xlane.f32.xlu0 %v50_v6  ;;  %s264_s29 = scalar_lea.vmem %s193_s28, 128  ;;  %p269_p9 = scmp.lt.s32.totalorder %s193_s28, %s193_s28 }
  0x18   :  { %35 = vadd.xlane.f32.xlu1 %v34_v7  ;;  %p265_p8 = scmp.ne.s32.totalorder %s193_s28, %s264_s29  ;;  %p270_p10 = scmp.lt.s32.totalorder %s264_s29, %s264_s29 }
  0x1a   :  { %p271_p11 = por %p270_p10, %p269_p9 }
  0x1b   :  { %54 = vadd.xlane.f32.xlu0 %v53_v8 }
  0x1c   :  { %p272_p12 = pnand %p271_p11, %p265_p8 }
  0x29   :  { %179 = vperm.xlu1 %226, %v177_v11  }
  0xa4   :  { %v52_v13 = vpop.xlane.xlu0 %51 }
  0xa5   :  { %v36_v14 = vpop.xlane.xlu1 %35  ;;  %228 = vrsqrt.f32 %v52_v13  ;;  %vm58_vm2 = vcmp.eq.f32.partialorder %v52_v13, inf  ;;  %v61_v19 = vand.u32 2147483648, %v52_v13  ;;  %vm60_vm3 = vcmp.eq.f32.partialorder %v52_v13, 0.0 }
  0xa6   :  { %230 = vrsqrt.f32 %v36_v14  ;;  %vm39_vm4 = vcmp.eq.f32.partialorder %v36_v14, inf  ;;  %v42_v27 = vand.u32 2147483648, %v36_v14  ;;  %vm41_vm7 = vcmp.eq.f32.partialorder %v36_v14, 0.0 }
  0xa8   :  { %v55_v15 = vpop.xlane.xlu0 %54 }
  0xa9   :  { %232 = vrsqrt.f32 %v55_v15  ;;  %vm65_vm5 = vcmp.eq.f32.partialorder %v55_v15, inf  ;;  %v68_v26 = vand.u32 2147483648, %v55_v15  ;;  %vm67_vm6 = vcmp.eq.f32.partialorder %v55_v15, 0.0  ;;  %v180_v53 = vpop.permute.xlu1 %179 }
  0xaa   :  { %vm181_vm11 = vcmp.eq.s32.totalorder %v159_v50, %v180_v53 }
  0xaf   :  { %v229_v16 = vpop.eup %228 }
  0xb0   :  { %v231_v17 = vpop.eup %230  ;;  %v57_v18 = vmul.f32 %v229_v16, %v52_v13 }
  0xb1   :  { %v38_v23 = vmul.f32 %v231_v17, %v36_v14 }
  0xb2   :  { %v59_v20 = vsel %vm58_vm2, %v52_v13, %v57_v18 }
  0xb3   :  { %v233_v21 = vpop.eup %232  ;;  %v62_v22 = vsel %vm60_vm3, %v61_v19, %v59_v20  ;;  %v40_v29 = vsel %vm39_vm4, %v36_v14, %v38_v23 }
  0xb4   :  { %v70_v24 = vmax.f32 %v62_v22, 1e-12  ;;  %v64_v25 = vmul.f32 %v233_v21, %v55_v15  ;;  %v43_v32 = vsel %vm41_vm7, %v42_v27, %v40_v29 }
  0xb5   :  { %v44_v33 = vmax.f32 %v43_v32, 1e-12 }
  0xb6   :  { %v66_v28 = vsel %vm65_vm5, %v55_v15, %v64_v25  ;;  %234 = vrcp.f32 %v70_v24 }
  0xb7   :  { %v69_v30 = vsel %vm67_vm6, %v68_v26, %v66_v28 }
  0xb8   :  { %v71_v31 = vmax.f32 %v69_v30, 1e-12 }
  0xba   :  { %236 = vrcp.f32 %v71_v31 }
  0xbb   :  { %238 = vrcp.f32 %v44_v33 }
  0xc0   :  { %v235_v34 = vpop.eup %234 }
  0xc1   :  { %v76_v36 = vmul.f32 %v235_v34, %v30_v0 }
  0xc4   :  { %v237_v35 = vpop.eup %236 }
  0xc5   :  { %v77_v37 = vmul.f32 %v237_v35, %v31_v2  ;;  %v239_v39 = vpop.eup %238 }
  0xc6   :  { %v47_v40 = vmul.f32 %v239_v39, %v29_v1 }
  0xc7   :  { %v215_v38 = vpack.c.bf16 %v77_v37, %v76_v36 }
  0xc9   :  { %217 = vmatpush3.bf16.xpose.msk.msra.mxu0 %vm216_vm8, %v215_v38 }
  0xd0   :  { %212 = vmatmul.mubr.msk.f32.vlgmr.msra.gmra.mrb[0].mxu0 %vm33_vm0, %v47_v40 }
 0x1a3   :  { %v153_v41 = vpop.f32.mrb[0].mxu0 }
 0x1a4   :  { %v162_v42 = vmul.f32 %v153_v41, %v153_v41  ;;  %v213_v43 = vpop.f32.mrb[1].mxu0  ;;  %v172_v54 = vmul.f32 0.87758255, %v153_v41  ;;  %vm175_vm12 = vcmp.gt.f32.partialorder %v153_v41, 0.0 }
 0x1a6   :  { %v163_v44 = vsub.f32 1.0, %v162_v42 }
 0x1a8   :  { %v164_v45 = vmax.f32 %v163_v44, 0.0 }
 0x1aa   :  { %240 = vrsqrt.f32 %v164_v45  ;;  %vm167_vm9 = vcmp.eq.f32.partialorder %v164_v45, inf  ;;  %v170_v49 = vand.u32 2147483648, %v164_v45  ;;  %vm169_vm10 = vcmp.eq.f32.partialorder %v164_v45, 0.0 }
 0x1b4   :  { %v241_v47 = vpop.eup %240 }
 0x1b5   :  { %v166_v48 = vmul.f32 %v241_v47, %v164_v45 }
 0x1b7   :  { %v168_v51 = vsel %vm167_vm9, %v164_v45, %v166_v48 }
 0x1b8   :  { %v171_v52 = vsel %vm169_vm10, %v170_v49, %v168_v51 }
 0x1b9   :  { %v173_v55 = vmul.f32 0.47942555, %v171_v52 }
 0x1bb   :  { %v174_v56 = vsub.f32 %v172_v54, %v173_v55 }
 0x1bd   :  { %v176_v57 = vsel %vm175_vm12, %v174_v56, %v153_v41 }
 0x1be   :  { %v182_v58 = vsel %vm181_vm11, %v176_v57, %v153_v41 }
 0x1bf   :  { %v183_v59 = vmul.f32 30.0, %v182_v58 }
 0x1c1   :  { %185 = vst.msk [vmem:[#allocation5] sm:$0xff] %vm184_vm13, %v183_v59 }
 0x1c2   :  { %275 = shalt.err (!%p272_p12)
}
 0x1c3   :  { %s276_s5 = scalar_lea.hbm %s357_s3, 128 }
 0x1c4   :  { %p277_p13 = scmp.ne.s32.totalorder %s357_s3, %s276_s5  ;;  %p280_p0 = scmp.lt.u32.totalorder %s276_s5, %s357_s3 }
 0x1c6   :  { %p282_p1 = pnand %p280_p0, %p277_p13 }
 0x1c8   :  { %285 = shalt.err (!%p282_p1)
}
 0x1c9   :  { %195 = dma.vmem_to_hbm [thread:$0]  %s193_s28, 128, %s357_s3, [#allocation4]  }
 0x1ca   :  { %288 = dma.done.wait [#allocation4], 128  }
 0x1cb   :  { %289 = vsyncadd [#allocation4], 4294967168 }
 0x1cc   :  { %199 = vsyncpa [#allocation3], 1 }
 0x1cd   :  { %200 = vsyncpa [#allocation4], 1 }

</bundles_post_ra>
